<compile_context>
chip_gen: v6e
topology: v6e:2x2x1
jax: 0.10.0
libtpu: 0.0.40
codegen_flags: <defaults>
</compile_context>

<pallas_src>
import jax
import jax.numpy as jnp
from jax import lax
from jax.experimental import pallas as pl
from jax.experimental.pallas import tpu as pltpu


def _senet_kernel(x_ref, w1_ref, w2_ref, o_ref):
    # x_ref : (Bb, C, L)  block of batch elements
    # w1_ref: (H, C)      first Linear weight (PyTorch layout: out x in)
    # w2_ref: (C, H)      second Linear weight
    # o_ref : (Bb, C, L)
    x = x_ref[...]                              # native dtype (no full-tile upcast)
    inv_l = 1.0 / x.shape[-1]

    # Squeeze: per-(batch, channel) mean over L, accumulated in f32.
    mean = jnp.sum(x, axis=-1, dtype=jnp.float32) * inv_l          # (Bb, C) f32

    # Excitation, batched over the Bb rows of this block.
    w1 = w1_ref[...].astype(jnp.float32)                           # (H, C)
    w2 = w2_ref[...].astype(jnp.float32)                           # (C, H)
    h = lax.dot_general(mean, w1, (((1,), (1,)), ((), ())),
                        preferred_element_type=jnp.float32)        # (Bb, H)
    h = jnp.maximum(h, 0.0)
    y = lax.dot_general(h, w2, (((1,), (1,)), ((), ())),
                        preferred_element_type=jnp.float32)        # (Bb, C)
    y = jax.nn.sigmoid(y)

    # Scale: channel-wise gate broadcast over L; cast the tiny gate, not x.
    o_ref[...] = (x * y.astype(x.dtype)[:, :, None]).astype(o_ref.dtype)


def _choose_batch_block(B, C, L, itemsize,
                        target_bytes=4 << 20, vmem_budget=32 << 20):
    """Pick the per-step batch-block size Bb (a divisor of B)."""
    per_batch = max(1, C * L * itemsize)
    # Input + output blocks are each double-buffered => ~4x block bytes in VMEM.
    vmem_cap = max(1, vmem_budget // (4 * per_batch))
    target_cap = max(1, target_bytes // per_batch)
    cap = min(B, vmem_cap, target_cap)
    # Keep at least 2 grid steps when possible (feeds both v7x TensorCores).
    if B >= 2:
        cap = max(1, min(cap, B // 2))
    for bb in range(cap, 0, -1):
        if B % bb == 0:
            return bb
    return 1


def senet_forward(x, w1, w2):
    """x: (B, C, L), w1: (H, C), w2: (C, H). Returns (B, C, L)."""
    B, C, L = x.shape
    H = w1.shape[0]
    bb = _choose_batch_block(B, C, L, jnp.dtype(x.dtype).itemsize)
    grid = (B // bb,)
    return pl.pallas_call(
        _senet_kernel,
        out_shape=jax.ShapeDtypeStruct((B, C, L), x.dtype),
        grid_spec=pltpu.PrefetchScalarGridSpec(
            num_scalar_prefetch=0,
            grid=grid,
            in_specs=[
                pl.BlockSpec((bb, C, L), lambda b: (b, 0, 0)),
                # Tiny resident weights (constant index_map).
                pl.BlockSpec((H, C), lambda b: (0, 0)),
                pl.BlockSpec((C, H), lambda b: (0, 0)),
            ],
            out_specs=pl.BlockSpec((bb, C, L), lambda b: (b, 0, 0)),
        ),
        compiler_params=pltpu.CompilerParams(
            dimension_semantics=("parallel",)),
    )(x, w1, w2)


def senet_reference(x, w1, w2):
    """Pure-JAX reference mirroring the PyTorch forward."""
    mean = jnp.mean(x, axis=-1)                        # (B, C)
    h = jnp.maximum(mean @ w1.T, 0.0)                  # (B, H)
    y = jax.nn.sigmoid(h @ w2.T)                       # (B, C)
    return x * y[..., None]


if __name__ == "__main__":
    # Shapes implied by the module: channel=64, reduction=16 -> hidden=4.
    C, L = 64, 128
    reduction = 16
    H = C // reduction

    key = jax.random.PRNGKey(0)
    kx, k1, k2, kx2 = jax.random.split(key, 4)

    # PyTorch Linear layout, deterministic synthetic weights.
    w1 = jax.random.normal(k1, (H, C), dtype=jnp.float32) * (1.0 / jnp.sqrt(C))
    w2 = jax.random.normal(k2, (C, H), dtype=jnp.float32) * (1.0 / jnp.sqrt(H))

    # Case 1: small batch (B=2) -> Bb=1, grid=(2,)
    x = jax.random.normal(kx, (2, C, L), dtype=jnp.float32)
    out = jax.block_until_ready(senet_forward(x, w1, w2))
    ref = senet_reference(x, w1, w2)
    assert out.shape == x.shape
    assert jnp.allclose(out, ref, atol=1e-5, rtol=1e-5), "mismatch vs reference (B=2)"

    # Case 2: larger batch (B=8) -> Bb=4, grid=(2,), exercises batched excitation.
    x2 = jax.random.normal(kx2, (8, C, L), dtype=jnp.float32)
    out2 = jax.block_until_ready(senet_forward(x2, w1, w2))
    ref2 = senet_reference(x2, w1, w2)
    assert out2.shape == x2.shape
    assert jnp.allclose(out2, ref2, atol=1e-5, rtol=1e-5), "mismatch vs reference (B=8)"

    print("KERNEL_OK")
</pallas_src>

<mosaic_0001>
module attributes {stable_mosaic.version = 11 : i64} {
  func.func @_senet_kernel(%arg0: i32, %arg1: memref<1x64x128xf32, #tpu.memory_space<vmem>>, %arg2: memref<4x64xf32, #tpu.memory_space<vmem>>, %arg3: memref<64x4xf32, #tpu.memory_space<vmem>>, %arg4: memref<1x64x128xf32, #tpu.memory_space<vmem>>) attributes {dimension_semantics = [#tpu.dimension_semantics<parallel>], iteration_bounds = array<i64: 2>, scalar_prefetch = 0 : i64, scratch_operands = 0 : i64, tpu.core_type = #tpu.core_type<tc>, window_params = [{transform_indices = @transform_0, window_bounds = array<i64: 1, 64, 128>}, {pipeline_mode = #tpu.pipeline_mode<synchronous>, transform_indices = @transform_1, window_bounds = array<i64: 4, 64>}, {pipeline_mode = #tpu.pipeline_mode<synchronous>, transform_indices = @transform_2, window_bounds = array<i64: 64, 4>}, {transform_indices = @transform_3, window_bounds = array<i64: 1, 64, 128>}]} {
    %c0 = arith.constant 0 : index
    %c0_0 = arith.constant 0 : index
    %c0_1 = arith.constant 0 : index
    %0 = vector.load %arg1[%c0, %c0_0, %c0_1] : memref<1x64x128xf32, #tpu.memory_space<vmem>>, vector<1x64x128xf32>
    %cst = arith.constant dense<0.000000e+00> : vector<1x64xf32>
    %1 = vector.multi_reduction <add>, %0, %cst [2] : vector<1x64x128xf32> to vector<1x64xf32>
    %cst_2 = arith.constant 7.812500e-03 : f32
    %2 = vector.broadcast %cst_2 : f32 to vector<1x64xf32>
    %3 = arith.mulf %1, %2 : vector<1x64xf32>
    %c0_3 = arith.constant 0 : index
    %c0_4 = arith.constant 0 : index
    %4 = vector.load %arg2[%c0_3, %c0_4] : memref<4x64xf32, #tpu.memory_space<vmem>>, vector<4x64xf32>
    %c0_5 = arith.constant 0 : index
    %c0_6 = arith.constant 0 : index
    %5 = vector.load %arg3[%c0_5, %c0_6] : memref<64x4xf32, #tpu.memory_space<vmem>>, vector<64x4xf32>
    %cst_7 = arith.constant dense<0.000000e+00> : vector<1x4xf32>
    %6 = tpu.matmul %3, %4, %cst_7 {dimension_numbers = #tpu.dot_dimension_numbers<[1], [1], [0], [0], [0, 0, 1, 0], [], []>} : vector<1x64xf32>, vector<4x64xf32>, vector<1x4xf32> -> vector<1x4xf32>
    %cst_8 = arith.constant 0.000000e+00 : f32
    %7 = vector.broadcast %cst_8 : f32 to vector<1x4xf32>
    %8 = arith.maximumf %6, %7 : vector<1x4xf32>
    %cst_9 = arith.constant dense<0.000000e+00> : vector<1x64xf32>
    %9 = tpu.matmul %8, %5, %cst_9 {dimension_numbers = #tpu.dot_dimension_numbers<[1], [1], [0], [0], [0, 0, 1, 0], [], []>} : vector<1x4xf32>, vector<64x4xf32>, vector<1x64xf32> -> vector<1x64xf32>
    %10 = arith.negf %9 : vector<1x64xf32>
    %11 = math.exp %10 : vector<1x64xf32>
    %cst_10 = arith.constant 1.000000e+00 : f32
    %12 = vector.broadcast %cst_10 : f32 to vector<1x64xf32>
    %13 = arith.addf %12, %11 : vector<1x64xf32>
    %14 = arith.divf %12, %13 : vector<1x64xf32>
    %15 = vector.shape_cast %14 : vector<1x64xf32> to vector<1x64x1xf32>
    %16 = vector.broadcast %15 : vector<1x64x1xf32> to vector<1x64x128xf32>
    %17 = arith.mulf %0, %16 : vector<1x64x128xf32>
    %c0_11 = arith.constant 0 : index
    %c0_12 = arith.constant 0 : index
    %c0_13 = arith.constant 0 : index
    %18 = vector.load %arg4[%c0_11, %c0_12, %c0_13] : memref<1x64x128xf32, #tpu.memory_space<vmem>>, vector<1x64x128xf32>
    tpu.vector_store %arg4[%c0_11, %c0_12, %c0_13], %17 {strides = array<i32>} : memref<1x64x128xf32, #tpu.memory_space<vmem>>, vector<1x64x128xf32>,
    return
  }
  func.func @transform_0(%arg0: i32) -> (i32, i32, i32) {
    %c0_i32 = arith.constant 0 : i32
    %c0_i32_0 = arith.constant 0 : i32
    %c0_i32_1 = arith.constant 0 : i32
    return %arg0, %c0_i32, %c0_i32_0 : i32, i32, i32
  }
  func.func @transform_1(%arg0: i32) -> (i32, i32) {
    %c0_i32 = arith.constant 0 : i32
    %c0_i32_0 = arith.constant 0 : i32
    %c0_i32_1 = arith.constant 0 : i32
    return %c0_i32, %c0_i32_0 : i32, i32
  }
  func.func @transform_2(%arg0: i32) -> (i32, i32) {
    %c0_i32 = arith.constant 0 : i32
    %c0_i32_0 = arith.constant 0 : i32
    %c0_i32_1 = arith.constant 0 : i32
    return %c0_i32, %c0_i32_0 : i32, i32
  }
  func.func @transform_3(%arg0: i32) -> (i32, i32, i32) {
    %c0_i32 = arith.constant 0 : i32
    %c0_i32_0 = arith.constant 0 : i32
    %c0_i32_1 = arith.constant 0 : i32
    return %arg0, %c0_i32, %c0_i32_0 : i32, i32, i32
  }
}

</mosaic_0001>

<bundles_post_ra>
// kernel: tpu_custom_call.1
= control target key start
LH: loop header
LB: loop body
LE: loop exit
PB: predicated region body
PF: predicated region fallthrough
CT: control target
= control target key end

     0   :  { %8 = vsyncpa [#allocation3], 0  ;;  %s1092_s0 = inlined_call_operand.hbm [shape: f32[2,64,128], index: 0, kind: input, shape index: {}]   ;;  %s1093_s1 = inlined_call_operand.vmem [shape: f32[4,64], index: 1, kind: input, shape index: {}]   ;;  %s1094_s2 = inlined_call_operand.vmem [shape: f32[64,4], index: 2, kind: input, shape index: {}]   ;;  %s1095_s3 = inlined_call_operand.hbm [shape: f32[2,64,128], index: 3, kind: output, shape index: {}]  }
   0x1   :  { %10 = vsyncpa [#allocation3 + $0x1], 0 }
   0x2   :  { %11 = vsyncpa [#allocation4], 0 }
   0x3   :  { %13 = vsyncpa [#allocation4 + $0x1], 0  ;;  %s853_s12 = smov 0   ;;  %s855_s13 = smov 0  }
   0x4   :  { %s857_s14 = smov 0   ;;  %s859_s15 = smov 0  }
   0x5 LB: > { %s874_s16 = sadd.s32 4294967295, %s823_s15   ;;  %s612_s17 = sadd.s32 4294967294, %s823_s15   ;;  %s823_s15 = sphi %s859_s15, %s1110_s15   ;;  %s819_s14 = sphi %s857_s14, %s1109_s14   ;;  %s815_s13 = sphi %s855_s13, %s1108_s13   ;;  %s811_s12 = sphi %s853_s12, %s1107_s12  }
   0x6   : > { %s878_s18 = sadd.s32 1, %s823_s15   ;;  %s26_s19 = sadd.s32 1, %s819_s14 }
   0x7   : > { %s23_s20 = ssub.s32 %s823_s15, %s878_s18  ;;  %p33_p0 = scmp.ne.s32.totalorder %s819_s14, %s815_s13 }
   0x8   : > { %p24_p1 = scmp.eq.s32.totalorder %s23_s20, 0  ;;  %p34_p2 = scmp.eq.s32.totalorder %s823_s15, 0 }
   0x9   : > { %p39_p3 = scmp.ne.s32.totalorder %s815_s13, %s811_s12  ;;  %p40_p4 = scmp.eq.s32.totalorder %s874_s16, 0 }
   0xa   : > { %s890_s21 = scalar_select %p24_p1, %s819_s14, %s26_s19  }
   0xb   : > { %p892_p5 = por %p34_p2, %p33_p0  ;;  %p896_p6 = por %p40_p4, %p39_p3 }
   0xc   : > { %p105_p7 = scmp.eq.s32.totalorder %s874_s16, 1  ;;  %p111_p8 = scmp.eq.s32.totalorder %s612_s17, 1 }
   0xd   : > { %s1099_s23 = scalar_select %p896_p6, 1, 0 }
   0xe   : > { %p687_p10 = scmp.lt.s32.totalorder %s823_s15, 2  ;;  %p903_p11 = por %p105_p7, %p33_p0 }
   0xf   : > { %p907_p12 = por %p111_p8, %p39_p3  ;;  %s137_s26 = sand.u32 1, %s819_s14  }
  0x10   : > { %s1100_s24 = scalar_select %p903_p11, 1, 0 }
  0x11   : > { %s1101_s25 = scalar_select %p907_p12, 1, 0 }
  0x12   : > { %s638_s27 = sshll.u32 %s823_s15, 10  ;;  %s615_s28 = sshll.u32 %s137_s26, 6 }
  0x13   : > { %s916_s4 = scalar_lea.hbm %s1092_s0, %s638_s27  ;;  %s141_s5 = scalar_lea.vmem [#allocation2], %s615_s28 }
  0x14   : > { %s148_s6 = sshll.u32 %s141_s5, 4  ;;  %p920_p13 = pnand %p687_p10, %p892_p5  ;;  %s924_s6 = int_to_ptr.vmem [resolvable:$true] %s148_s6 }
  0x15   : > { %s926_s8 = scalar_lea.sflag [#allocation3], %s137_s26  ;;  %s731_s9 = scalar_lea.hbm %s916_s4, 1024 }
  0x16   : > { %p732_p0 = scmp.ne.s32.totalorder %s916_s4, %s731_s9  ;;  %p733_p1 = pneg %p920_p13 }
  0x17   : > { %s736_s17 = scalar_lea.hbm %s1092_s0, 2048  ;;  %p737_p4 = scmp.lt.s32.totalorder %s916_s4, %s1092_s0 }
  0x18   : > { %p734_p2 = pnand %p733_p1, %p732_p0  ;;  %p738_p5 = scmp.lt.s32.totalorder %s736_s17, %s731_s9 }
  0x1a   : > { %p735_p3 = pneg %p734_p2  ;;  %p739_p7 = por %p738_p5, %p737_p4 }
  0x1c   : > { %p740_p8 = pnand %p739_p7, %p735_p3 }
  0x1e   : > { %743 = shalt.err (!%p740_p8)
}
  0x1f   : > { %s744_s22 = scalar_lea.vmem %s924_s6, 1024  ;;  %s825_s26 = smov [#allocation2]  }
  0x20   : > { %p745_p10 = scmp.ne.s32.totalorder %s924_s6, %s744_s22  ;;  %s749_s27 = sshll.u32 %s825_s26, 4  ;;  %s750_s27 = int_to_ptr.vmem [resolvable:$false] %s749_s27 }
  0x21   : > { %s751_s28 = scalar_lea.vmem %s750_s27, 2048  ;;  %p752_p2 = scmp.lt.s32.totalorder %s924_s6, %s750_s27 }
  0x22   : > { %p747_p9 = pnand %p745_p10, %p733_p1  ;;  %p753_p12 = scmp.lt.s32.totalorder %s751_s28, %s744_s22 }
  0x24   : > { %p748_p0 = pneg %p747_p9  ;;  %p754_p11 = por %p753_p12, %p752_p2 }
  0x26   : > { %p755_p6 = pnand %p754_p11, %p748_p0 }
  0x28   : > { %758 = shalt.err (!%p755_p6)
}
  0x29   : > { %s826_s29 = smov 128   ;;  %s827_s30 = smov 8  }
  0x2a   : > { %682 = dma.hbm_to_vmem [thread:$0]  (!%p920_p13), %s916_s4, 1024, %s924_s6, %s926_s8, %s826_s29, %s826_s29, %s827_s30  }
  0x2b   : > { %p618_p9 = scmp.ge.s32.totalorder %s823_s15, 1  ;;  %p156_p1 = scmp.lt.s32.totalorder %s823_s15, 3 }
  0x2d   : > { %p157_p3 = pnand %p618_p9, %p156_p1 }
  0x2e   : > { %s950_s5 = sand.u32 (!%p157_p3), 1, %s815_s13   ;;  %p1103_p6 = scmp.ne.s32.totalorder (!%p157_p3), %s1099_s23, 0 }
  0x2f   : > { %160 = sbr.rel (%p157_p3) target bundleno = 779 (0x30b), region = 32  ;;  %s619_s9 = sshll.u32 (!%p157_p3), %s950_s5, 6 }
  0x30   : > { %s163_s10 = scalar_lea.sflag (!%p157_p3), [#allocation3], %s950_s5  ;;  %s166_s11 = scalar_lea.vmem (!%p157_p3), [#allocation2], %s619_s9 }
  0x34   : > { %802 = dma.done.wait (%p1103_p6), %s163_s10, 1024  }
  0x35   : > { %804 = vsyncadd (%p1103_p6), %s163_s10, 4294966272  ;;  %v960_v0 = vld [vmem:[%s166_s11] sm:$0xff]  ;;  %v962_v1 = vld [vmem:[%s166_s11 + $0x10] sm:$0xff]  ;;  %v828_v8 = vmov 0.0   ;;  %vm293_vm0 = vcmask 523264   ;;  %vm829_vm1 = vmmov 0   ;;  %v238_v17 = vlaneseq }
  0x36   : > { %197 = vadd.xlane.f32.xlu0 %v960_v0  ;;  %201 = vadd.xlane.f32.xlu1 %v962_v1  ;;  %v966_v2 = vld [vmem:[%s166_s11 + $0x8] sm:$0xff]  ;;  %v968_v3 = vld [vmem:[%s166_s11 + $0x18] sm:$0xff]  ;;  %v972_v4 = vld [vmem:[%s166_s11 + $0x20] sm:$0xff]  ;;  %vm370_vm2 = vcmask 31744   ;;  %vm249_vm3 = vcmask 130112   ;;  %vm256_vm4 = vcmask 195712  }
  0x37   : > { %v974_v5 = vld [vmem:[%s166_s11 + $0x28] sm:$0xff]  ;;  %v978_v6 = vld [vmem:[%s166_s11 + $0x30] sm:$0xff]  ;;  %v980_v7 = vld [vmem:[%s166_s11 + $0x38] sm:$0xff]  ;;  %651 = vmatprep.subr.mxu0 %v828_v8  ;;  %656 = vmatprep.subr.mxu1 %v828_v8  ;;  %v239_v18 = vand.u32 127, %v238_v17  ;;  %v1016_v19 = vshrl.u32 %v238_v17, 7  ;;  %vm263_vm5 = vcmask 261312  }
  0x38   : > { %v221_v9 = vld [vmem:[%s1093_s1] sm:$0xf]  ;;  %653 = vmatprep.mubr.msk.f32.mxu0 %vm829_vm1, %v828_v8  ;;  %672 = vmatprep.mubr.msk.f32.mxu1 %vm829_vm1, %v828_v8  ;;  %v229_v10 = vld [vmem:[%s1094_s2 + $0x38] sm:$0xff]  ;;  %v228_v11 = vld [vmem:[%s1094_s2 + $0x30] sm:$0xff]  ;;  %vm270_vm6 = vcmask 326912   ;;  %vm277_vm7 = vcmask 392512  }
  0x39   : > { %652 = vmatpush3.xpose.msk.msra.mxu0 %vm293_vm0, %v221_v9  ;;  %657 = vmatpush3.xpose.msk.msra.mxu1 %vm370_vm2, %v229_v10  ;;  %v227_v12 = vld [vmem:[%s1094_s2 + $0x28] sm:$0xff]  ;;  %v226_v13 = vld [vmem:[%s1094_s2 + $0x20] sm:$0xff]  ;;  %v225_v14 = vld [vmem:[%s1094_s2 + $0x18] sm:$0xff]  ;;  %v244_v20 = vadd.s32 4294967288, %v239_v18  ;;  %v258_v21 = vadd.s32 4294967272, %v239_v18  ;;  %v251_v23 = vadd.s32 4294967280, %v239_v18  ;;  %v242_v26 = vsub.s32 %v239_v18, %v1016_v19 }
  0x3a   : > { %199 = vadd.xlane.f32.xlu0 %v966_v2  ;;  %203 = vadd.xlane.f32.xlu1 %v968_v3  ;;  %v224_v15 = vld [vmem:[%s1094_s2 + $0x10] sm:$0xff]  ;;  %v223_v16 = vld [vmem:[%s1094_s2 + $0x8] sm:$0xff]  ;;  %v265_v25 = vadd.s32 4294967264, %v239_v18  ;;  %v272_v34 = vadd.s32 4294967256, %v239_v18  ;;  %v279_v38 = vadd.s32 4294967248, %v239_v18  ;;  %v286_v42 = vadd.s32 4294967240, %v239_v18 }
  0x3b   : > { %658 = vmatprep.subr.mxu1 %v828_v8  ;;  %v247_v28 = vsub.s32 %v244_v20, %v1016_v19  ;;  %v261_v29 = vsub.s32 %v258_v21, %v1016_v19  ;;  %v254_v30 = vsub.s32 %v251_v23, %v1016_v19  ;;  %vm284_vm8 = vcmask 458112   ;;  %v222_v10 = vld [vmem:[%s1094_s2] sm:$0xff]  ;;  %s188_s6 = scalar_lea.vmem [#allocation5], %s619_s9  ;;  %s639_s7 = sshll.u32 %s874_s16, 10 }
  0x3c   : > { %v268_v37 = vsub.s32 %v265_v25, %v1016_v19  ;;  %v275_v45 = vsub.s32 %v272_v34, %v1016_v19  ;;  %v282_v53 = vsub.s32 %v279_v38, %v1016_v19  ;;  %v289_v54 = vsub.s32 %v286_v42, %v1016_v19  ;;  %s539_s9 = sshll.u32 %s188_s6, 4  ;;  %s1048_s19 = scalar_lea.hbm %s1095_s3, %s639_s7  ;;  %s1043_s9 = int_to_ptr.vmem [resolvable:$true] %s539_s9 }
  0x3d   : > { %659 = vmatpush3.xpose.msk.msra.mxu1 %vm370_vm2, %v228_v11  ;;  %vm291_vm9 = vcmask 523712   ;;  %v476_v20 = vsub.s32 0, %v1016_v19  ;;  %s526_s20 = scalar_lea.sflag [#allocation4], %s950_s5  ;;  %s759_s22 = scalar_lea.vmem %s1043_s9, 1024 }
  0x3e   : > { %205 = vadd.xlane.f32.xlu0 %v972_v4  ;;  %207 = vadd.xlane.f32.xlu1 %v974_v5  ;;  %p760_p11 = scmp.ne.s32.totalorder %s1043_s9, %s759_s22  ;;  %p1104_p12 = scmp.ne.s32.totalorder %s1100_s24, 0 }
  0x3f   : > { %660 = vmatprep.subr.mxu1 %v828_v8  ;;  %s830_s16 = smov [#allocation5]  }
  0x40   : > { %p761_p13 = pnand %p760_p11, %p1104_p12  ;;  %s763_s26 = sshll.u32 %s830_s16, 4  ;;  %s764_s26 = int_to_ptr.vmem [resolvable:$false] %s763_s26 }
  0x41   : > { %661 = vmatpush3.xpose.msk.msra.mxu1 %vm370_vm2, %v227_v12  ;;  %s765_s27 = scalar_lea.vmem %s764_s26, 2048  ;;  %p766_p5 = scmp.lt.s32.totalorder %s1043_s9, %s764_s26 }
  0x42   : > { %209 = vadd.xlane.f32.xlu0 %v978_v6  ;;  %211 = vadd.xlane.f32.xlu1 %v980_v7  ;;  %p762_p4 = pneg %p761_p13  ;;  %p767_p7 = scmp.lt.s32.totalorder %s765_s27, %s759_s22 }
  0x43   : > { %662 = vmatprep.subr.mxu1 %v828_v8 }
  0x44   : > { %p768_p8 = por %p767_p7, %p766_p5 }
  0x45   : > { %663 = vmatpush3.xpose.msk.msra.mxu1 %vm370_vm2, %v226_v13 }
  0x46   : > { %664 = vmatprep.subr.mxu1 %v828_v8  ;;  %p769_p10 = pnand %p768_p8, %p762_p4 }
  0x49   : > { %665 = vmatpush3.xpose.msk.msra.mxu1 %vm370_vm2, %v225_v14 }
  0x4a   : > { %666 = vmatprep.subr.mxu1 %v828_v8 }
  0x4d   : > { %667 = vmatpush3.xpose.msk.msra.mxu1 %vm370_vm2, %v224_v15 }
  0x4e   : > { %668 = vmatprep.subr.mxu1 %v828_v8 }
  0x51   : > { %669 = vmatpush3.xpose.msk.msra.mxu1 %vm370_vm2, %v223_v16 }
  0x52   : > { %670 = vmatprep.subr.mxu1 %v828_v8 }
  0x55   : > { %671 = vmatpush3.xpose.msk.msra.mxu1 %vm370_vm2, %v222_v10 }
  0xbf   : > { %v198_v22 = vpop.xlane.xlu0 %197  ;;  %v202_v24 = vpop.xlane.xlu1 %201 }
  0xc0   : > { %v213_v27 = vmul.f32 0.0078125, %v198_v22  ;;  %v215_v31 = vmul.f32 0.0078125, %v202_v24 }
  0xc2   : > { %v243_v39 = vrot.slane %v213_v27, %v242_v26  ;;  %v255_v43 = vrot.slane %v215_v31, %v254_v30 }
  0xc3   : > { %v200_v32 = vpop.xlane.xlu0 %199  ;;  %v204_v33 = vpop.xlane.xlu1 %203 }
  0xc4   : > { %v214_v35 = vmul.f32 0.0078125, %v200_v32  ;;  %v216_v36 = vmul.f32 0.0078125, %v204_v33 }
  0xc6   : > { %v248_v40 = vrot.slane %v214_v35, %v247_v28  ;;  %v262_v41 = vrot.slane %v216_v36, %v261_v29 }
  0xc7   : > { %v206_v44 = vpop.xlane.xlu0 %205  ;;  %v208_v46 = vpop.xlane.xlu1 %207 }
  0xc8   : > { %v250_v47 = vsel %vm249_vm3, %v248_v40, %v243_v39  ;;  %v217_v48 = vmul.f32 0.0078125, %v206_v44  ;;  %v218_v49 = vmul.f32 0.0078125, %v208_v46 }
  0xc9   : > { %v257_v50 = vsel %vm256_vm4, %v255_v43, %v250_v47 }
  0xca   : > { %v264_v51 = vsel %vm263_vm5, %v262_v41, %v257_v50  ;;  %v269_v52 = vrot.slane %v217_v48, %v268_v37  ;;  %v276_v55 = vrot.slane %v218_v49, %v275_v45 }
  0xcb   : > { %v210_v56 = vpop.xlane.xlu0 %209  ;;  %v212_v57 = vpop.xlane.xlu1 %211 }
  0xcc   : > { %v271_v58 = vsel %vm270_vm6, %v269_v52, %v264_v51  ;;  %v219_v59 = vmul.f32 0.0078125, %v210_v56  ;;  %v220_v60 = vmul.f32 0.0078125, %v212_v57 }
  0xcd   : > { %v278_v63 = vsel %vm277_vm7, %v276_v55, %v271_v58 }
  0xce   : > { %v283_v61 = vrot.slane %v219_v59, %v282_v53  ;;  %v290_v62 = vrot.slane %v220_v60, %v289_v54 }
  0xd0   : > { %v285_v8 = vsel %vm284_vm8, %v283_v61, %v278_v63 }
  0xd1   : > { %v292_v9 = vsel %vm291_vm9, %v290_v62, %v285_v8 }
  0xd2   : > { %654 = vmatmul.mubr.msk.f32.vlgmr.msra.gmra.mxu0 %vm293_vm0, %v292_v9 }
 0x192   : > { %v365_v11 = vpop.f32.mrf.mxu0 }
 0x193   : > { %v369_v12 = vmax.f32 %v365_v11, 0.0 }
 0x194   : > { %v655_v13 = vpop.f32.mrf.mxu0 }
 0x195   : > { %673 = vmatmul.mubr.msk.f32.vlgmr.msra.gmra.mxu1 %vm370_vm2, %v369_v12 }
 0x255   : > { %v464_v14 = vpop.f32.mrf.mxu1 }
 0x256   : > { %v632_v15 = vmul.f32 -1.442695, %v464_v14 }
 0x257   : > { %v674_v16 = vpop.f32.mrf.mxu1 }
 0x258   : > { %727 = vpow2.f32 %v632_v15 }
 0x265   : > { %v728_v17 = vpop.eup %727 }
 0x266   : > { %v471_v18 = vadd.f32 1.0, %v728_v17 }
 0x268   : > { %729 = vrcp.f32 %v471_v18 }
 0x275   : > { %v730_v21 = vpop.eup %729 }
 0x276   : > { %v477_v22 = vrot.slane %v730_v21, %v476_v20 }
 0x278   : > { %483 = vbcast.lane.b32.xlu1 %v477_v22, 264  ;;  %479 = vbcast.lane.b32.xlu0 %v477_v22, 256 }
 0x27c   : > { %487 = vbcast.lane.b32.xlu1 %v477_v22, 272  ;;  %495 = vbcast.lane.b32.xlu0 %v477_v22, 288 }
 0x280   : > { %491 = vbcast.lane.b32.xlu1 %v477_v22, 280  ;;  %503 = vbcast.lane.b32.xlu0 %v477_v22, 304 }
 0x284   : > { %499 = vbcast.lane.b32.xlu1 %v477_v22, 296 }
 0x288   : > { %507 = vbcast.lane.b32.xlu1 %v477_v22, 312 }
 0x2ea   : > { %v484_v23 = vpop.permute.xlu1 %483  ;;  %v480_v24 = vpop.permute.xlu0 %479 }
 0x2eb   : > { %v510_v25 = vmul.f32 %v484_v23, %v966_v2  ;;  %v509_v26 = vmul.f32 %v480_v24, %v960_v0 }
 0x2ed   : > { %518 = vst [vmem:[%s188_s6 + $0x8] sm:$0xff] %v510_v25  ;;  %517 = vst [vmem:[%s188_s6] sm:$0xff] %v509_v26 }
 0x2ee   : > { %v488_v19 = vpop.permute.xlu1 %487  ;;  %v496_v27 = vpop.permute.xlu0 %495 }
 0x2ef   : > { %v511_v28 = vmul.f32 %v488_v19, %v962_v1  ;;  %v513_v29 = vmul.f32 %v496_v27, %v972_v4 }
 0x2f1   : > { %519 = vst [vmem:[%s188_s6 + $0x10] sm:$0xff] %v511_v28  ;;  %521 = vst [vmem:[%s188_s6 + $0x20] sm:$0xff] %v513_v29 }
 0x2f2   : > { %v492_v30 = vpop.permute.xlu1 %491  ;;  %v504_v31 = vpop.permute.xlu0 %503 }
 0x2f3   : > { %v512_v2 = vmul.f32 %v492_v30, %v968_v3  ;;  %v515_v0 = vmul.f32 %v504_v31, %v978_v6 }
 0x2f5   : > { %520 = vst [vmem:[%s188_s6 + $0x18] sm:$0xff] %v512_v2  ;;  %523 = vst [vmem:[%s188_s6 + $0x30] sm:$0xff] %v515_v0 }
 0x2f6   : > { %v500_v32 = vpop.permute.xlu1 %499 }
 0x2f7   : > { %v514_v33 = vmul.f32 %v500_v32, %v974_v5 }
 0x2f9   : > { %522 = vst [vmem:[%s188_s6 + $0x28] sm:$0xff] %v514_v33 }
 0x2fa   : > { %v508_v1 = vpop.permute.xlu1 %507 }
 0x2fb   : > { %v516_v3 = vmul.f32 %v508_v1, %v980_v7 }
 0x2fd   : > { %524 = vst [vmem:[%s188_s6 + $0x38] sm:$0xff] %v516_v3 }
 0x2fe   : > { %772 = shalt.err (!%p769_p10)
}
 0x2ff   : > { %s773_s28 = scalar_lea.hbm %s1048_s19, 1024  ;;  %s777_s10 = scalar_lea.hbm %s1095_s3, 2048 }
 0x300   : > { %p774_p0 = scmp.ne.s32.totalorder %s1048_s19, %s773_s28  ;;  %p778_p1 = scmp.lt.s32.totalorder %s1048_s19, %s1095_s3 }
 0x301   : > { %p779_p3 = scmp.lt.s32.totalorder %s777_s10, %s773_s28 }
 0x302   : > { %p775_p2 = pnand %p774_p0, %p1104_p12 }
 0x303   : > { %p780_p6 = por %p779_p3, %p778_p1 }
 0x304   : > { %p776_p9 = pneg %p775_p2 }
 0x306   : > { %p781_p11 = pnand %p780_p6, %p776_p9 }
 0x308   : > { %784 = shalt.err (!%p781_p11)
}
 0x309   : > { %s831_s4 = smov 128   ;;  %s832_s6 = smov 8  }
 0x30a   : > { %677 = dma.vmem_to_hbm [thread:$0]  (%p1104_p12), %s1043_s9, 1024, %s1048_s19, %s526_s20, %s831_s4, %s831_s4, %s832_s6  }
 0x30b PF: > { %s554_s7 = sand.u32 1, %s811_s12   ;;  %p1105_p13 = scmp.ne.s32.totalorder %s1101_s25, 0 }
 0x30c   : > { %p1106_p4 = scmp.ge.s32.totalorder %s823_s15, 2  ;;  %s555_s8 = scalar_lea.sflag [#allocation4], %s554_s7 }
 0x30e   : > { %p684_p5 = pnand %p1106_p4, %p1105_p13 }
 0x310   : > { %p685_p7 = pneg %p684_p5 }
 0x312   : > { %806 = dma.done.wait (%p685_p7), %s555_s8, 1024  }
 0x313   : > { %808 = vsyncadd (%p685_p7), %s555_s8, 4294966272  ;;  %p16_p8 = scmp.ge.s32.totalorder %s878_s18, 4   ;;  %s1107_s12 = smov %s815_s13 }
 0x314   : > { %s1108_s13 = smov %s819_s14  ;;  %s1109_s14 = smov %s890_s21 }
 0x315   : > { %s1110_s15 = smov %s878_s18  ;;  %18 = sbr.rel (!%p16_p8) target bundleno = 5 (0x5), region = 77 }
 0x31a   :  { %560 = vsyncpa [#allocation3], 1 }
 0x31b   :  { %562 = vsyncpa [#allocation3 + $0x1], 1 }
 0x31c   :  { %563 = vsyncpa [#allocation4], 1 }
 0x31d   :  { %565 = vsyncpa [#allocation4 + $0x1], 1 }

</bundles_post_ra>
